<compile_context>
chip_gen: v7x
topology: tpu7x:2x2x1
jax: 0.10.0
libtpu: 0.0.40
codegen_flags: <defaults>
</compile_context>

<pallas_src>
import functools

import jax
import jax.numpy as jnp
from jax import lax
from jax.experimental import pallas as pl
from jax.experimental.pallas import tpu as pltpu


def _round_up(v, m):
    return ((v + m - 1) // m) * m


def _pick_cout_tile(c_out, desired):
    """Largest multiple-of-8 divisor of c_out that is <= desired (else full)."""
    if c_out <= desired or c_out % 8 != 0:
        return c_out
    cand = min(desired - desired % 8, c_out)
    while cand >= 8:
        if c_out % cand == 0:
            return cand
        cand -= 8
    return c_out


def _physical_vmem_bytes():
    try:
        return int(pltpu.get_tpu_info().vmem_capacity_bytes)
    except Exception:
        return 64 * 1024 * 1024  # be conservative: v7x per-TC VMEM


def _conv1d_k1_kernel(x_ref, w_ref, b_ref, o_ref):
    # 1x1 conv (module default kernel_size=1): plain matmul, no halo / im2col.
    o_ref[...] = (jnp.dot(w_ref[...], x_ref[...],
                          preferred_element_type=jnp.float32)
                  + b_ref[...]).astype(o_ref.dtype)


def _conv1d_kernel(x_ref, xh_ref, w_ref, b_ref, o_ref, *,
                   kernel_size, dilation, t_tile):
    # x_ref : (C_in, t_tile)          xh_ref : (C_in, halo_blk)
    # w_ref : (c_out_tile, K*C_in)    b_ref  : (c_out_tile, 1) f32
    # o_ref : (c_out_tile, t_tile)
    x_full = jnp.concatenate([x_ref[...], xh_ref[...]], axis=-1)
    # im2col: one operand with contraction depth K*C_in -> a single deep MXU
    # matmul (accumulation lives in the MXU, not in a VMEM f32 accumulator).
    x_col = jnp.concatenate(
        [x_full[:, k * dilation: k * dilation + t_tile]
         for k in range(kernel_size)], axis=0)
    o_ref[...] = (jnp.dot(w_ref[...], x_col,
                          preferred_element_type=jnp.float32)
                  + b_ref[...]).astype(o_ref.dtype)


def conv_norm_forward(x, weight, bias, *, stride=1, padding=None, dilation=1,
                      time_tile=1024, cout_tile=512,
                      compute_dtype=jnp.bfloat16):
    """Pallas implementation of ConvNorm.forward (Conv1d, stride=1)."""
    if stride != 1:
        # TODO(synk): strided conv (stride > 1) not implemented; module default is 1.
        raise NotImplementedError("stride != 1 not supported")
    B, c_in, T = x.shape
    c_out, c_in_w, K = weight.shape
    assert c_in == c_in_w
    if padding is None:
        assert K % 2 == 1
        padding = int(dilation * (K - 1) / 2)

    halo = dilation * (K - 1)
    t_out = T + 2 * padding - halo
    has_halo = halo > 0
    halo_blk = _round_up(halo, 128) if has_halo else 0

    # ---- C_out tiling: default big enough that c_out usually fits one tile ----
    c_out_tile = _pick_cout_tile(c_out, cout_tile)
    n_co = c_out // c_out_tile

    # ---- time tiling: lane-aligned, multiple of halo_blk ---------------------
    unit = halo_blk if has_halo else 128
    t_cap = time_tile
    if B == 1 and n_co == 1 and t_out > unit:
        # v7x has 2 TensorCores: keep >=2 iterations on a parallel axis.
        t_cap = min(t_cap, _round_up(pl.cdiv(t_out, 2), 128))
    t_tile = min(_round_up(t_cap, unit), _round_up(t_out, unit))
    t_tile = max(t_tile, unit)
    n_t = pl.cdiv(t_out, t_tile)
    halo_ratio = (t_tile // halo_blk) if has_halo else 0

    # ---- operand prep: one pad covers conv padding + tile alignment ----------
    # (keeps every INPUT block fully in-bounds; only the trailing OUTPUT block
    # is partial and masked by Pallas — no wrapper-side output slice.)
    t_total = n_t * t_tile + halo_blk
    x_c = jnp.pad(x.astype(compute_dtype),
                  ((0, 0), (0, 0), (padding, t_total - padding - T)))
    # im2col weight layout: contraction index = k * c_in + c.
    w2d = (jnp.transpose(weight, (0, 2, 1))
           .reshape(c_out, K * c_in).astype(compute_dtype))
    bias2d = bias.reshape(c_out, 1).astype(jnp.float32)

    # ---- specs ---------------------------------------------------------------
    x_spec = pl.BlockSpec((None, c_in, t_tile), lambda b, co, t: (b, 0, t))
    w_spec = pl.BlockSpec((c_out_tile, K * c_in), lambda b, co, t: (co, 0))
    b_spec = pl.BlockSpec((c_out_tile, 1), lambda b, co, t: (co, 0))
    o_spec = pl.BlockSpec((None, c_out_tile, t_tile),
                          lambda b, co, t: (b, co, t))

    if has_halo:
        # 128-aligned halo block immediately after the main time tile.
        xh_spec = pl.BlockSpec((None, c_in, halo_blk),
                               lambda b, co, t: (b, 0, (t + 1) * halo_ratio))
        in_specs = [x_spec, xh_spec, w_spec, b_spec]
        operands = (x_c, x_c, w2d, bias2d)
        kernel = functools.partial(_conv1d_kernel, kernel_size=K,
                                   dilation=dilation, t_tile=t_tile)
    else:
        # K == 1: skip the useless halo DMA / pipeline buffer entirely.
        in_specs = [x_spec, w_spec, b_spec]
        operands = (x_c, w2d, bias2d)
        kernel = _conv1d_k1_kernel

    # ---- VMEM budget: actual need (2x buffered blocks + intermediates) -------
    out_itemsize = jnp.dtype(x.dtype).itemsize
    in_itemsize = jnp.dtype(compute_dtype).itemsize
    kc = K * c_in
    block_bytes = 2 * (c_in * t_tile * in_itemsize
                       + c_in * halo_blk * in_itemsize
                       + c_out_tile * kc * in_itemsize
                       + c_out_tile * 128 * 4           # bias, lane-padded
                       + c_out_tile * t_tile * out_itemsize)
    scratch_bytes = (c_in * (t_tile + halo_blk) * in_itemsize   # x_full
                     + kc * t_tile * in_itemsize                # im2col operand
                     + c_out_tile * t_tile * 4)                 # f32 dot result
    vmem_need = block_bytes + scratch_bytes
    phys = _physical_vmem_bytes()
    vmem_limit = max(32 * 1024 * 1024,
                     min(2 * vmem_need + (4 << 20), int(phys * 0.8)))

    flops = 2 * B * c_out * kc * t_out
    bytes_accessed = (B * n_co * c_in * t_total * in_itemsize   # x (+ halo refetch)
                      + B * c_out * kc * in_itemsize            # weight
                      + c_out * 4                               # bias
                      + B * c_out * t_out * out_itemsize)       # output

    out = pl.pallas_call(
        kernel,
        out_shape=jax.ShapeDtypeStruct((B, c_out, t_out), x.dtype),
        grid_spec=pltpu.PrefetchScalarGridSpec(
            num_scalar_prefetch=0,
            grid=(B, n_co, n_t),
            in_specs=in_specs,
            out_specs=o_spec,
        ),
        compiler_params=pltpu.CompilerParams(
            dimension_semantics=("parallel", "parallel", "parallel"),
            vmem_limit_bytes=int(vmem_limit),
        ),
        cost_estimate=pl.CostEstimate(flops=int(flops), transcendentals=0,
                                      bytes_accessed=int(bytes_accessed)),
    )(*operands)
    return out


def init_conv_norm_params(key, in_channels, out_channels, kernel_size,
                          w_init_gain="linear"):
    """xavier_uniform weight init + PyTorch-default uniform bias init."""
    gain = 1.0  # torch.nn.init.calculate_gain('linear') == 1.0
    fan_in = in_channels * kernel_size
    fan_out = out_channels * kernel_size
    limit = gain * (6.0 / (fan_in + fan_out)) ** 0.5
    wkey, bkey = jax.random.split(key)
    weight = jax.random.uniform(
        wkey, (out_channels, in_channels, kernel_size),
        dtype=jnp.float32, minval=-limit, maxval=limit)
    b_limit = 1.0 / (fan_in ** 0.5)
    bias = jax.random.uniform(bkey, (out_channels,), dtype=jnp.float32,
                              minval=-b_limit, maxval=b_limit)
    return weight, bias


def _reference(x, weight, bias, *, dilation, padding,
               compute_dtype=jnp.bfloat16):
    # Match the kernel's bf16 operand rounding, f32 accumulation.
    xr = x.astype(compute_dtype).astype(jnp.float32)
    wr = weight.astype(compute_dtype).astype(jnp.float32)
    out = lax.conv_general_dilated(
        xr, wr, window_strides=(1,), padding=[(padding, padding)],
        rhs_dilation=(dilation,), dimension_numbers=("NCH", "OIH", "NCH"))
    return out + bias.reshape(1, -1, 1)


if __name__ == "__main__":
    keys = jax.random.split(jax.random.PRNGKey(0), 6)

    # Config 1: small shapes, K=3 (halo path, single time tile, full C_out).
    B, C_IN, C_OUT, T, K = 2, 4, 8, 16, 3
    x = jax.random.normal(keys[0], (B, C_IN, T), dtype=jnp.float32)
    weight, bias = init_conv_norm_params(keys[1], C_IN, C_OUT, K)
    out = jax.block_until_ready(conv_norm_forward(x, weight, bias, dilation=1))
    ref = _reference(x, weight, bias, dilation=1, padding=(K - 1) // 2)
    assert out.shape == (B, C_OUT, T), out.shape
    assert jnp.allclose(out, ref, atol=1e-3, rtol=1e-3), "mismatch (config 1)"

    # Config 2: multiple time tiles (halo + partial last output block),
    # C_out tiling and dilation, still small.
    B2, C_IN2, C_OUT2, T2, K2, DIL2 = 1, 16, 16, 300, 5, 2
    x2 = jax.random.normal(keys[2], (B2, C_IN2, T2), dtype=jnp.float32)
    w2, b2 = init_conv_norm_params(keys[3], C_IN2, C_OUT2, K2)
    out2 = jax.block_until_ready(
        conv_norm_forward(x2, w2, b2, dilation=DIL2,
                          time_tile=128, cout_tile=8))
    ref2 = _reference(x2, w2, b2, dilation=DIL2, padding=DIL2 * (K2 - 1) // 2)
    assert out2.shape == (B2, C_OUT2, T2), out2.shape
    assert jnp.allclose(out2, ref2, atol=1e-3, rtol=1e-3), "mismatch (config 2)"

    # Config 3: module-default kernel_size=1 fast path (no halo, no im2col).
    B3, C_IN3, C_OUT3, T3, K3 = 2, 8, 16, 40, 1
    x3 = jax.random.normal(keys[4], (B3, C_IN3, T3), dtype=jnp.float32)
    w3, b3 = init_conv_norm_params(keys[5], C_IN3, C_OUT3, K3)
    out3 = jax.block_until_ready(conv_norm_forward(x3, w3, b3, dilation=1))
    ref3 = _reference(x3, w3, b3, dilation=1, padding=0)
    assert out3.shape == (B3, C_OUT3, T3), out3.shape
    assert jnp.allclose(out3, ref3, atol=1e-3, rtol=1e-3), "mismatch (config 3)"

    print("KERNEL_OK")
</pallas_src>

<mosaic_0001>
module attributes {stable_mosaic.version = 11 : i64} {
  func.func @_conv1d_kernel(%arg0: i32, %arg1: i32, %arg2: i32, %arg3: memref<1x4x128xbf16, #tpu.memory_space<vmem>>, %arg4: memref<1x4x128xbf16, #tpu.memory_space<vmem>>, %arg5: memref<8x12xbf16, #tpu.memory_space<vmem>>, %arg6: memref<8x1xf32, #tpu.memory_space<vmem>>, %arg7: memref<1x8x128xf32, #tpu.memory_space<vmem>>) attributes {dimension_semantics = [#tpu.dimension_semantics<parallel>, #tpu.dimension_semantics<parallel>, #tpu.dimension_semantics<parallel>], iteration_bounds = array<i64: 2, 1, 1>, scalar_prefetch = 0 : i64, scratch_operands = 0 : i64, tpu.core_type = #tpu.core_type<tc>, window_params = [{transform_indices = @transform_0, window_bounds = array<i64: 1, 4, 128>}, {transform_indices = @transform_1, window_bounds = array<i64: 1, 4, 128>}, {transform_indices = @transform_2, window_bounds = array<i64: 8, 12>}, {transform_indices = @transform_3, window_bounds = array<i64: 8, 1>}, {transform_indices = @transform_4, window_bounds = array<i64: 1, 8, 128>}]} {
    %c0 = arith.constant 0 : index
    %c0_0 = arith.constant 0 : index
    %c0_1 = arith.constant 0 : index
    %0 = vector.load %arg3[%c0, %c0_0, %c0_1] : memref<1x4x128xbf16, #tpu.memory_space<vmem>>, vector<1x4x128xbf16>
    %1 = vector.shape_cast %0 : vector<1x4x128xbf16> to vector<4x128xbf16>
    %c0_2 = arith.constant 0 : index
    %c0_3 = arith.constant 0 : index
    %c0_4 = arith.constant 0 : index
    %2 = vector.load %arg4[%c0_2, %c0_3, %c0_4] : memref<1x4x128xbf16, #tpu.memory_space<vmem>>, vector<1x4x128xbf16>
    %3 = vector.shape_cast %2 : vector<1x4x128xbf16> to vector<4x128xbf16>
    %4 = tpu.concatenate %1, %3 in 1 : vector<4x128xbf16>, vector<4x128xbf16> -> vector<4x256xbf16>
    %5 = vector.extract_strided_slice %4 {offsets = [0, 0], sizes = [4, 128], strides = [1, 1]} : vector<4x256xbf16> to vector<4x128xbf16>
    %6 = vector.extract_strided_slice %4 {offsets = [0, 1], sizes = [4, 128], strides = [1, 1]} : vector<4x256xbf16> to vector<4x128xbf16>
    %7 = vector.extract_strided_slice %4 {offsets = [0, 2], sizes = [4, 128], strides = [1, 1]} : vector<4x256xbf16> to vector<4x128xbf16>
    %8 = tpu.concatenate %5, %6, %7 in 0 : vector<4x128xbf16>, vector<4x128xbf16>, vector<4x128xbf16> -> vector<12x128xbf16>
    %c0_5 = arith.constant 0 : index
    %c0_6 = arith.constant 0 : index
    %9 = vector.load %arg5[%c0_5, %c0_6] : memref<8x12xbf16, #tpu.memory_space<vmem>>, vector<8x12xbf16>
    %cst = arith.constant dense<0.000000e+00> : vector<8x128xf32>
    %10 = tpu.matmul %9, %8, %cst {dimension_numbers = #tpu.dot_dimension_numbers<[1], [0], [0], [1], [0, 0, 1, 1], [], []>} : vector<8x12xbf16>, vector<12x128xbf16>, vector<8x128xf32> -> vector<8x128xf32>
    %c0_7 = arith.constant 0 : index
    %c0_8 = arith.constant 0 : index
    %11 = vector.load %arg6[%c0_7, %c0_8] : memref<8x1xf32, #tpu.memory_space<vmem>>, vector<8x1xf32>
    %12 = vector.broadcast %11 : vector<8x1xf32> to vector<8x128xf32>
    %13 = arith.addf %10, %12 : vector<8x128xf32>
    %c0_9 = arith.constant 0 : index
    %c0_10 = arith.constant 0 : index
    %c0_11 = arith.constant 0 : index
    %14 = vector.load %arg7[%c0_9, %c0_10, %c0_11] : memref<1x8x128xf32, #tpu.memory_space<vmem>>, vector<1x8x128xf32>
    %15 = vector.shape_cast %14 : vector<1x8x128xf32> to vector<8x128xf32>
    %16 = vector.shape_cast %13 : vector<8x128xf32> to vector<1x8x128xf32>
    tpu.vector_store %arg7[%c0_9, %c0_10, %c0_11], %16 {strides = array<i32>} : memref<1x8x128xf32, #tpu.memory_space<vmem>>, vector<1x8x128xf32>,
    return
  }
  func.func @transform_0(%arg0: i32, %arg1: i32, %arg2: i32) -> (i32, i32, i32) {
    %c0_i32 = arith.constant 0 : i32
    %c0_i32_0 = arith.constant 0 : i32
    return %arg0, %c0_i32, %arg2 : i32, i32, i32
  }
  func.func @transform_1(%arg0: i32, %arg1: i32, %arg2: i32) -> (i32, i32, i32) {
    %c1_i32 = arith.constant 1 : i32
    %0 = arith.addi %arg2, %c1_i32 : i32
    %c1_i32_0 = arith.constant 1 : i32
    %1 = arith.muli %0, %c1_i32_0 : i32
    %c0_i32 = arith.constant 0 : i32
    %c0_i32_1 = arith.constant 0 : i32
    return %arg0, %c0_i32, %1 : i32, i32, i32
  }
  func.func @transform_2(%arg0: i32, %arg1: i32, %arg2: i32) -> (i32, i32) {
    %c0_i32 = arith.constant 0 : i32
    %c0_i32_0 = arith.constant 0 : i32
    return %arg1, %c0_i32 : i32, i32
  }
  func.func @transform_3(%arg0: i32, %arg1: i32, %arg2: i32) -> (i32, i32) {
    %c0_i32 = arith.constant 0 : i32
    %c0_i32_0 = arith.constant 0 : i32
    return %arg1, %c0_i32 : i32, i32
  }
  func.func @transform_4(%arg0: i32, %arg1: i32, %arg2: i32) -> (i32, i32, i32) {
    %c0_i32 = arith.constant 0 : i32
    return %arg0, %arg1, %arg2 : i32, i32, i32
  }
}

</mosaic_0001>

<bundles_post_ra>
// kernel: tpu_custom_call.1
= control target key start
LH: loop header
LB: loop body
LE: loop exit
PB: predicated region body
PF: predicated region fallthrough
CT: control target
= control target key end

     0   :  { %9 = vsyncpa [#allocation3], 0  ;;  %s969_s0 = inlined_call_operand.vmem [shape: bf16[2,4,256], index: 0, kind: input, shape index: {}]   ;;  %s970_s1 = inlined_call_operand.hbm [shape: bf16[2,4,256], index: 1, kind: input, shape index: {}]   ;;  %s971_s2 = inlined_call_operand.vmem [shape: bf16[8,12], index: 2, kind: input, shape index: {}]   ;;  %s972_s3 = inlined_call_operand.vmem [shape: f32[8,1], index: 3, kind: input, shape index: {}]   ;;  %s973_s4 = inlined_call_operand.hbm [shape: f32[2,8,16], index: 4, kind: output, shape index: {}]  }
   0x1   :  { %11 = vsyncpa [#allocation3 + $0x1], 0 }
   0x2   :  { %12 = vsyncpa [#allocation4], 0 }
   0x3   :  { %14 = vsyncpa [#allocation4 + $0x1], 0  ;;  %s786_s15 = smov 0   ;;  %s788_s16 = smov 0  }
   0x4   :  { %s790_s17 = smov 0   ;;  %s792_s18 = smov 0  }
   0x5   :  { %s794_s19 = smov 0   ;;  %s796_s20 = smov 0  }
   0x6 LB: > { %s542_s21 = sadd.s32 4294967295, %s752_s20   ;;  %s543_s22 = sadd.s32 4294967294, %s752_s20   ;;  %s752_s20 = sphi %s796_s20, %s20_s20   ;;  %s748_s19 = sphi %s794_s19, %s989_s19   ;;  %s744_s18 = sphi %s792_s18, %s988_s18   ;;  %s740_s17 = sphi %s790_s17, %s987_s17   ;;  %s736_s16 = sphi %s788_s16, %s986_s16   ;;  %s732_s15 = sphi %s786_s15, %s985_s15  }
   0x7   : > { %s39_s23 = sadd.s32 1, %s748_s19  ;;  %s78_s24 = sadd.s32 1, %s740_s17 }
   0x8   : > { %p41_p0 = scmp.ge.s32.totalorder %s39_s23, 2  ;;  %p85_p1 = scmp.ne.s32.totalorder %s740_s17, %s736_s16 }
   0x9   : > { %p86_p2 = scmp.eq.s32.totalorder %s752_s20, 0  ;;  %p91_p3 = scmp.ne.s32.totalorder %s736_s16, %s732_s15 }
   0xa   : > { %s991_s23 = smov (%p41_p0, %s39_s23), 0  ;;  %p92_p5 = scmp.eq.s32.totalorder %s542_s21, 0 }
   0xb   : > { %p827_p4 = por %p86_p2, %p85_p1  ;;  %s73_s26 = ssub.s32 %s748_s19, %s991_s23 }
   0xc   : > { %p171_p6 = scmp.eq.s32.totalorder %s542_s21, 1  ;;  %p76_p7 = scmp.eq.s32.totalorder %s73_s26, 0 }
   0xd   : > { %p833_p8 = por %p92_p5, %p91_p3  ;;  %p177_p10 = scmp.eq.s32.totalorder %s543_s22, 1 }
   0xe   : > { %p837_p9 = por %p171_p6, %p85_p1  ;;  %p583_p13 = scmp.lt.s32.totalorder %s752_s20, 2 }
   0xf   : > { %s842_s29 = scalar_select %p76_p7, %s740_s17, %s78_s24  }
  0x10   : > { %s977_s28 = scalar_select %p837_p9, 1, 0 }
  0x11   : > { %p844_p11 = por %p177_p10, %p91_p3  ;;  %s222_s5 = sand.u32 1, %s740_s17  }
  0x12   : > { %s548_s6 = sshll.u32 %s222_s5, 1  ;;  %s561_s7 = sshll.u32 %s748_s19, 6 }
  0x13   : > { %s978_s30 = scalar_select %p844_p11, 1, 0 }
  0x14   : > { %s446_s10 = scalar_lea.hbm %s970_s1, %s561_s7  ;;  %s226_s11 = scalar_lea.vmem [#allocation2], %s548_s6 }
  0x15   : > { %s236_s12 = sshll.u32 %s226_s11, 4  ;;  %s855_s13 = scalar_lea.hbm %s446_s10, 32  ;;  %s857_s12 = int_to_ptr.vmem [resolvable:$true] %s236_s12 }
  0x16   : > { %p861_p0 = pnand %p583_p13, %p827_p4  ;;  %s223_s21 = scalar_lea.sflag [#allocation3], %s222_s5 }
  0x17   : > { %s669_s22 = scalar_lea.hbm %s446_s10, 64  ;;  %s644_s25 = scalar_lea.hbm %s970_s1, 128 }
  0x18   : > { %p640_p3 = scmp.ne.s32.totalorder %s855_s13, %s669_s22  ;;  %p641_p5 = pneg %p861_p0 }
  0x19   : > { %p645_p4 = scmp.lt.u32.totalorder %s855_s13, %s970_s1  ;;  %p646_p10 = scmp.lt.u32.totalorder %s644_s25, %s669_s22 }
  0x1a   : > { %p642_p6 = pnand %p641_p5, %p640_p3  ;;  %p648_p12 = scmp.lt.u32.totalorder %s669_s22, %s855_s13 }
  0x1b   : > { %p647_p13 = por %p646_p10, %p645_p4 }
  0x1c   : > { %p643_p7 = pneg %p642_p6 }
  0x1d   : > { %p649_p1 = por %p648_p12, %p647_p13 }
  0x1f   : > { %p650_p2 = pnand %p649_p1, %p643_p7 }
  0x21   : > { %653 = shalt.err (!%p650_p2)
}
  0x22   : > { %s654_s5 = scalar_lea.vmem %s857_s12, 32  ;;  %s754_s8 = smov [#allocation2]  }
  0x23   : > { %p655_p3 = scmp.ne.s32.totalorder %s857_s12, %s654_s5  ;;  %s659_s9 = sshll.u32 %s754_s8, 4  ;;  %s660_s9 = int_to_ptr.vmem [resolvable:$false] %s659_s9 }
  0x24   : > { %s661_s10 = scalar_lea.vmem %s660_s9, 64  ;;  %p662_p9 = scmp.lt.s32.totalorder %s857_s12, %s660_s9 }
  0x25   : > { %p657_p6 = pnand %p655_p3, %p641_p5  ;;  %p663_p4 = scmp.lt.s32.totalorder %s661_s10, %s654_s5 }
  0x27   : > { %p658_p11 = pneg %p657_p6  ;;  %p664_p10 = por %p663_p4, %p662_p9 }
  0x29   : > { %p665_p12 = pnand %p664_p10, %p658_p11 }
  0x2b   : > { %668 = shalt.err (!%p665_p12)
}
  0x2c   : > { %578 = dma.hbm_to_vmem [thread:$0]  (!%p861_p0), %s855_s13, 32, %s857_s12, %s223_s21  }
  0x2d   : > { %p980_p1 = scmp.lt.s32.totalorder %s752_s20, 3  ;;  %p981_p2 = scmp.ge.s32.totalorder %s752_s20, 1 }
  0x2f   : > { %p242_p5 = pnand %p981_p2, %p980_p1 }
  0x30   : > { %s896_s11 = sand.u32 (!%p242_p5), 1, %s736_s16  }
  0x31   : > { %245 = sbr.rel (%p242_p5) target bundleno = 420 (0x1a4), region = 36  ;;  %s552_s22 = sshll.u32 (!%p242_p5), %s896_s11, 1 }
  0x32   : > { %s248_s24 = scalar_lea.sflag (!%p242_p5), [#allocation3], %s896_s11  ;;  %s251_s26 = scalar_lea.vmem (!%p242_p5), [#allocation2], %s552_s22 }
  0x38   : > { %723 = dma.done.wait (%p833_p8), %s248_s24, 32  }
  0x39   : > { %725 = vsyncadd (%p833_p8), %s248_s24, 4294967264  ;;  %p292_p9 = scmp.lt.s32.totalorder %s744_s18, 1  ;;  %v755_v0 = vmov 0.0   ;;  %vm756_vm0 = vmmov 0   ;;  %v311_v2 = vld [vmem:[%s251_s26] sm:$0x3] }
  0x3a   : > { %565 = vmatprep.subr.bf16.mxu0 %v755_v0  ;;  %567 = vmatprep.mubr.msk.bf16.mxu0 %vm756_vm0, %v755_v0  ;;  %s757_s6 = smov 126   ;;  %s758_s27 = smov 127   ;;  %v323_v5 = vrot.slane %v311_v2, 4  ;;  %v315_v6 = vrot.slane %v311_v2, 6  ;;  %v759_v7 = vmov 0   ;;  %v338_v8 = vld [vmem:[%s972_s3] sm:$0xff] }
  0x3b   : > { %s293_s12 = scalar_select %p292_p9, %s744_s18, 1  ;;  %638 = vset.pattern.permute.xlu0 %v759_v7  ;;  %vm328_vm1 = vcmask 1031168   ;;  %vm320_vm2 = vcmask 1039360   ;;  %vm330_vm3 = vcmask 1041408   ;;  %vm334_vm4 = vcmask 1043456  }
  0x3c   : > { %vm348_vm5 = vcmask 1045504   ;;  %v337_v18 = vld [vmem:[%s971_s2] sm:$0xf]  ;;  %vm344_vm6 = vcmask 97280   ;;  %s553_s10 = sshll.u32 %s896_s11, 3  ;;  %s558_s22 = sshll.u32 %s744_s18, 7 }
  0x3d   : > { %s562_s13 = sshll.u32 %s293_s12, 2  ;;  %s291_s24 = scalar_lea.vmem [#allocation5], %s553_s10 }
  0x3e   : > { %s299_s25 = scalar_lea.vmem %s969_s0, %s562_s13  ;;  %s408_s26 = sshll.u32 %s291_s24, 4  ;;  %s922_s26 = int_to_ptr.vmem [resolvable:$true] %s408_s26 }
  0x3f   : > { %v310_v1 = vld [vmem:[%s299_s25] sm:$0x3]  ;;  %s920_s14 = scalar_lea.hbm %s973_s4, %s558_s22  ;;  %s393_s21 = scalar_lea.sflag [#allocation4], %s896_s11 }
  0x40   : > { %v322_v3 = vrot.slane %v310_v1, 4  ;;  %v314_v4 = vrot.slane %v310_v1, 6  ;;  %s670_s18 = scalar_lea.vmem %s922_s26, 128  ;;  %p982_p11 = scmp.ne.s32.totalorder %s977_s28, 0 }
  0x41   : > { %p671_p8 = scmp.ne.s32.totalorder %s922_s26, %s670_s18  ;;  %s760_s25 = smov [#allocation5]  }
  0x42   : > { %324 = vrot.lane.b32.xlu1 %v322_v3, %s757_s6  ;;  %316 = vrot.lane.b32.xlu0 %v314_v4, %s758_s27 }
  0x43   : > { %p672_p0 = pnand %p671_p8, %p982_p11 }
  0x45   : > { %p673_p7 = pneg %p672_p0 }
  0x46   : > { %326 = vrot.lane.b32.xlu1 %v323_v5, %s757_s6  ;;  %318 = vrot.lane.b32.xlu0 %v315_v6, %s758_s27  ;;  %s674_s6 = sshll.u32 %s760_s25, 4  ;;  %s675_s6 = int_to_ptr.vmem [resolvable:$false] %s674_s6 }
  0x47   : > { %s676_s27 = scalar_lea.vmem %s675_s6, 256  ;;  %p677_p13 = scmp.lt.s32.totalorder %s922_s26, %s675_s6 }
  0x48   : > { %p678_p3 = scmp.lt.s32.totalorder %s676_s27, %s670_s18 }
  0x4a   : > { %341 = vperm.xlu0 %638, %v338_v8   ;;  %p679_p6 = por %p678_p3, %p677_p13 }
  0x4c   : > { %p680_p4 = pnand %p679_p6, %p673_p7 }
  0xb4   : > { %v325_v9 = vpop.permute.xlu1 %324  ;;  %v317_v10 = vpop.permute.xlu0 %316 }
  0xb8   : > { %v327_v11 = vpop.permute.xlu1 %326  ;;  %v319_v12 = vpop.permute.xlu0 %318 }
  0xb9   : > { %v329_v13 = vsel %vm328_vm1, %v325_v9, %v327_v11  ;;  %v321_v14 = vsel %vm320_vm2, %v317_v10, %v319_v12 }
  0xba   : > { %v333_v15 = vsel %vm330_vm3, %v310_v1, %v321_v14 }
  0xbb   : > { %v336_v16 = vsel %vm334_vm4, %v333_v15, %v329_v13 }
  0xbc   : > { %v349_v17 = vsel %vm348_vm5, %v336_v16, 0 }
  0xbd   : > { %566 = vmatpush3.bf16.msra.mxu0 %v349_v17 }
  0xc0   : > { %568 = vmatmul.mubr.msk.bf16.vlgmr.msra.gmra.mrb[0].mxu0 %vm344_vm6, %v337_v18 }
  0xc9   : > { %v342_v19 = vpop.permute.xlu0 %341 }
 0x193   : > { %v385_v20 = vpop.f32.mrb[0].mxu0 }
 0x194   : > { %v386_v21 = vadd.f32 %v385_v20, %v342_v19  ;;  %v569_v22 = vpop.f32.mrb[1].mxu0 }
 0x195   : > { %v388_v23 = vpop.f32.mrb[2].mxu0 }
 0x196   : > { %391 = vst [vmem:[%s291_s24] sm:$0xff] %v386_v21  ;;  %v570_v24 = vpop.f32.mrb[3].mxu0 }
 0x197   : > { %683 = shalt.err (!%p680_p4)
}
 0x198   : > { %s684_s11 = scalar_lea.hbm %s920_s14, 128  ;;  %s688_s8 = scalar_lea.hbm %s973_s4, 256 }
 0x199   : > { %p685_p10 = scmp.ne.s32.totalorder %s920_s14, %s684_s11  ;;  %p689_p2 = scmp.lt.u32.totalorder %s920_s14, %s973_s4 }
 0x19a   : > { %p690_p5 = scmp.lt.u32.totalorder %s688_s8, %s684_s11  ;;  %p692_p8 = scmp.lt.u32.totalorder %s684_s11, %s920_s14 }
 0x19b   : > { %p686_p12 = pnand %p685_p10, %p982_p11 }
 0x19c   : > { %p691_p9 = por %p690_p5, %p689_p2 }
 0x19d   : > { %p687_p1 = pneg %p686_p12 }
 0x19e   : > { %p693_p0 = por %p692_p8, %p691_p9 }
 0x1a0   : > { %p694_p7 = pnand %p693_p0, %p687_p1 }
 0x1a2   : > { %697 = shalt.err (!%p694_p7)
}
 0x1a3   : > { %573 = dma.vmem_to_hbm [thread:$0]  (%p982_p11), %s922_s26, 128, %s920_s14, %s393_s21  }
 0x1a4 PF: > { %s420_s22 = sand.u32 1, %s732_s15   ;;  %p983_p13 = scmp.ne.s32.totalorder %s978_s30, 0 }
 0x1a5   : > { %p984_p3 = scmp.ge.s32.totalorder %s752_s20, 2  ;;  %s421_s24 = scalar_lea.sflag [#allocation4], %s420_s22 }
 0x1a7   : > { %p580_p6 = pnand %p984_p3, %p983_p13 }
 0x1a9   : > { %727 = dma.done.wait (!%p580_p6), %s421_s24, 128  }
 0x1aa   : > { %729 = vsyncadd (!%p580_p6), %s421_s24, 4294967168  ;;  %s20_s20 = sadd.s32 1, %s752_s20   ;;  %s985_s15 = smov %s736_s16 }
 0x1ab   : > { %p17_p4 = scmp.ge.s32.totalorder %s20_s20, 4   ;;  %s986_s16 = smov %s740_s17 }
 0x1ac   : > { %s987_s17 = smov %s842_s29  ;;  %s988_s18 = smov %s748_s19 }
 0x1ad   : > { %s989_s19 = smov %s991_s23  ;;  %19 = sbr.rel (!%p17_p4) target bundleno = 6 (0x6), region = 90 }
 0x1b4   :  { %426 = vsyncpa [#allocation3], 1 }
 0x1b5   :  { %428 = vsyncpa [#allocation3 + $0x1], 1 }
 0x1b6   :  { %429 = vsyncpa [#allocation4], 1 }
 0x1b7   :  { %431 = vsyncpa [#allocation4 + $0x1], 1 }

</bundles_post_ra>
